<compile_context>
chip_gen: v5e
topology: v5e:2x2
jax: 0.10.0
libtpu: 0.0.40
codegen_flags: <defaults>
</compile_context>

<pallas_src>
import functools

import jax
import jax.numpy as jnp
from jax.experimental import pallas as pl
from jax.experimental.pallas import tpu as pltpu

NUM_FEATURES = 9   # ['Pclass','Sex','Age','SibSp','Parch','C','Q','S', nan]
H1 = 256
H2 = 8
OUT = 2
LANE = 128


def mlp_kernel(x_ref, w1_ref, b1_ref, w2_ref, b2_ref, w3_ref, b3_ref, o_ref):
    # layer 1: (256, 9) @ (9, TB) in bf16 on the MXU, f32 accumulation.
    h1 = jnp.dot(w1_ref[...], x_ref[...], preferred_element_type=jnp.float32)
    h1 = jnp.maximum(h1 + b1_ref[...], 0.0)
    # layer 2: (8, 256) @ (256, TB) in f32.
    h2 = jnp.dot(w2_ref[...], h1, preferred_element_type=jnp.float32)
    h2 = jnp.maximum(h2 + b2_ref[...], 0.0)
    # layer 3: (2, 8) @ (8, TB) + bias; result is a lane-dense (2, TB) block,
    # so the writeback is an unmasked contiguous store.
    o_ref[...] = (
        jnp.dot(w3_ref[...], h2, preferred_element_type=jnp.float32) + b3_ref[...]
    )


@functools.partial(jax.jit, static_argnames=("tb",))
def net_forward(x, params, tb=512):
    """x: (B, NUM_FEATURES) f32.  params in torch layout: w (out, in), b (out,)."""
    w1, b1, w2, b2, w3, b3 = params
    B = x.shape[0]

    # Pad batch to a multiple of the tile (tile itself a multiple of 128 lanes)
    # and flip to the lane-dense (features, batch) layout.
    bp = pl.cdiv(B, LANE) * LANE
    tb = min(tb, bp)
    bp = pl.cdiv(bp, tb) * tb
    xt = jnp.zeros((NUM_FEATURES, bp), jnp.bfloat16)
    xt = xt.at[:, :B].set(x.T.astype(jnp.bfloat16))

    # bf16 inputs for the layer-1 MXU matmul; biases as (out, 1) columns so they
    # broadcast along the lane (batch) axis inside the kernel.
    w1b = w1.astype(jnp.bfloat16)
    b1c = b1.reshape(H1, 1)
    b2c = b2.reshape(H2, 1)
    b3c = b3.reshape(OUT, 1)

    resident = lambda a: pl.BlockSpec(a.shape, lambda i: (0,) * a.ndim)

    out_t = pl.pallas_call(
        mlp_kernel,
        out_shape=jax.ShapeDtypeStruct((OUT, bp), jnp.float32),
        grid=(bp // tb,),
        in_specs=[
            pl.BlockSpec((NUM_FEATURES, tb), lambda i: (0, i)),  # x batch tile
            resident(w1b), resident(b1c),                        # weights stay
            resident(w2), resident(b2c),                         # VMEM-resident
            resident(w3), resident(b3c),
        ],
        out_specs=pl.BlockSpec((OUT, tb), lambda i: (0, i)),
        compiler_params=pltpu.CompilerParams(
            dimension_semantics=("parallel",)),
    )(xt, w1b, b1c, w2, b2c, w3, b3c)

    return out_t[:, :B].T


def init_params(key):
    """Deterministic init mimicking torch.nn.Linear default:
    U(-1/sqrt(fan_in), 1/sqrt(fan_in)); weights stored torch-style (out, in)."""
    def linear(key, fan_in, fan_out):
        kw, kb = jax.random.split(key)
        bound = 1.0 / jnp.sqrt(jnp.float32(fan_in))
        w = jax.random.uniform(kw, (fan_out, fan_in), jnp.float32, -bound, bound)
        b = jax.random.uniform(kb, (fan_out,), jnp.float32, -bound, bound)
        return w, b

    k1, k2, k3 = jax.random.split(key, 3)
    w1, b1 = linear(k1, NUM_FEATURES, H1)
    w2, b2 = linear(k2, H1, H2)
    w3, b3 = linear(k3, H2, OUT)
    return (w1, b1, w2, b2, w3, b3)


def reference_forward(x, params):
    w1, b1, w2, b2, w3, b3 = params
    # Mirror the kernel's bf16 layer-1 inputs (f32 accumulation) for a tight check.
    xb = x.astype(jnp.bfloat16).astype(jnp.float32)
    w1b = w1.astype(jnp.bfloat16).astype(jnp.float32)
    h1 = jnp.maximum(xb @ w1b.T + b1, 0.0)
    h2 = jnp.maximum(h1 @ w2.T + b2, 0.0)
    return h2 @ w3.T + b3


if __name__ == "__main__":
    key = jax.random.PRNGKey(0)
    kx, kp = jax.random.split(key)

    # Titanic-sized batch: exercises batch padding (891 -> 1024) and a 2-step
    # "parallel" grid with TB = 512.
    B = 891
    x = jax.random.normal(kx, (B, NUM_FEATURES), jnp.float32)
    params = init_params(kp)

    out = net_forward(x, params)
    out = jax.block_until_ready(out)

    ref = reference_forward(x, params)
    assert out.shape == (B, OUT)
    assert jnp.allclose(out, ref, atol=1e-3, rtol=1e-3), float(
        jnp.max(jnp.abs(out - ref)))

    print("KERNEL_OK")
</pallas_src>

<mosaic_0001>
module attributes {stable_mosaic.version = 11 : i64} {
  func.func @mlp_kernel(%arg0: i32, %arg1: memref<9x512xbf16, #tpu.memory_space<vmem>>, %arg2: memref<256x9xbf16, #tpu.memory_space<vmem>>, %arg3: memref<256x1xf32, #tpu.memory_space<vmem>>, %arg4: memref<8x256xf32, #tpu.memory_space<vmem>>, %arg5: memref<8x1xf32, #tpu.memory_space<vmem>>, %arg6: memref<2x8xf32, #tpu.memory_space<vmem>>, %arg7: memref<2x1xf32, #tpu.memory_space<vmem>>, %arg8: memref<2x512xf32, #tpu.memory_space<vmem>>) attributes {dimension_semantics = [#tpu.dimension_semantics<parallel>], iteration_bounds = array<i64: 2>, scalar_prefetch = 0 : i64, scratch_operands = 0 : i64, tpu.core_type = #tpu.core_type<tc>, window_params = [{transform_indices = @transform_0, window_bounds = array<i64: 9, 512>}, {pipeline_mode = #tpu.pipeline_mode<synchronous>, transform_indices = @transform_1, window_bounds = array<i64: 256, 9>}, {pipeline_mode = #tpu.pipeline_mode<synchronous>, transform_indices = @transform_2, window_bounds = array<i64: 256, 1>}, {pipeline_mode = #tpu.pipeline_mode<synchronous>, transform_indices = @transform_3, window_bounds = array<i64: 8, 256>}, {pipeline_mode = #tpu.pipeline_mode<synchronous>, transform_indices = @transform_4, window_bounds = array<i64: 8, 1>}, {pipeline_mode = #tpu.pipeline_mode<synchronous>, transform_indices = @transform_5, window_bounds = array<i64: 2, 8>}, {pipeline_mode = #tpu.pipeline_mode<synchronous>, transform_indices = @transform_6, window_bounds = array<i64: 2, 1>}, {transform_indices = @transform_7, window_bounds = array<i64: 2, 512>}]} {
    %c0 = arith.constant 0 : index
    %c0_0 = arith.constant 0 : index
    %0 = vector.load %arg2[%c0, %c0_0] : memref<256x9xbf16, #tpu.memory_space<vmem>>, vector<256x9xbf16>
    %c0_1 = arith.constant 0 : index
    %c0_2 = arith.constant 0 : index
    %1 = vector.load %arg1[%c0_1, %c0_2] : memref<9x512xbf16, #tpu.memory_space<vmem>>, vector<9x512xbf16>
    %cst = arith.constant dense<0.000000e+00> : vector<256x512xf32>
    %2 = tpu.matmul %0, %1, %cst {dimension_numbers = #tpu.dot_dimension_numbers<[1], [0], [0], [1], [0, 0, 1, 1], [], []>} : vector<256x9xbf16>, vector<9x512xbf16>, vector<256x512xf32> -> vector<256x512xf32>
    %c0_3 = arith.constant 0 : index
    %c0_4 = arith.constant 0 : index
    %3 = vector.load %arg3[%c0_3, %c0_4] : memref<256x1xf32, #tpu.memory_space<vmem>>, vector<256x1xf32>
    %4 = vector.broadcast %3 : vector<256x1xf32> to vector<256x512xf32>
    %5 = arith.addf %2, %4 : vector<256x512xf32>
    %cst_5 = arith.constant 0.000000e+00 : f32
    %6 = vector.broadcast %cst_5 : f32 to vector<256x512xf32>
    %7 = arith.maximumf %5, %6 : vector<256x512xf32>
    %c0_6 = arith.constant 0 : index
    %c0_7 = arith.constant 0 : index
    %8 = vector.load %arg4[%c0_6, %c0_7] : memref<8x256xf32, #tpu.memory_space<vmem>>, vector<8x256xf32>
    %cst_8 = arith.constant dense<0.000000e+00> : vector<8x512xf32>
    %9 = tpu.matmul %8, %7, %cst_8 {dimension_numbers = #tpu.dot_dimension_numbers<[1], [0], [0], [1], [0, 0, 1, 1], [], []>} : vector<8x256xf32>, vector<256x512xf32>, vector<8x512xf32> -> vector<8x512xf32>
    %c0_9 = arith.constant 0 : index
    %c0_10 = arith.constant 0 : index
    %10 = vector.load %arg5[%c0_9, %c0_10] : memref<8x1xf32, #tpu.memory_space<vmem>>, vector<8x1xf32>
    %11 = vector.broadcast %10 : vector<8x1xf32> to vector<8x512xf32>
    %12 = arith.addf %9, %11 : vector<8x512xf32>
    %cst_11 = arith.constant 0.000000e+00 : f32
    %13 = vector.broadcast %cst_11 : f32 to vector<8x512xf32>
    %14 = arith.maximumf %12, %13 : vector<8x512xf32>
    %c0_12 = arith.constant 0 : index
    %c0_13 = arith.constant 0 : index
    %15 = vector.load %arg6[%c0_12, %c0_13] : memref<2x8xf32, #tpu.memory_space<vmem>>, vector<2x8xf32>
    %cst_14 = arith.constant dense<0.000000e+00> : vector<2x512xf32>
    %16 = tpu.matmul %15, %14, %cst_14 {dimension_numbers = #tpu.dot_dimension_numbers<[1], [0], [0], [1], [0, 0, 1, 1], [], []>} : vector<2x8xf32>, vector<8x512xf32>, vector<2x512xf32> -> vector<2x512xf32>
    %c0_15 = arith.constant 0 : index
    %c0_16 = arith.constant 0 : index
    %17 = vector.load %arg7[%c0_15, %c0_16] : memref<2x1xf32, #tpu.memory_space<vmem>>, vector<2x1xf32>
    %18 = vector.broadcast %17 : vector<2x1xf32> to vector<2x512xf32>
    %19 = arith.addf %16, %18 : vector<2x512xf32>
    %c0_17 = arith.constant 0 : index
    %c0_18 = arith.constant 0 : index
    %20 = vector.load %arg8[%c0_17, %c0_18] : memref<2x512xf32, #tpu.memory_space<vmem>>, vector<2x512xf32>
    tpu.vector_store %arg8[%c0_17, %c0_18], %19 {strides = array<i32>} : memref<2x512xf32, #tpu.memory_space<vmem>>, vector<2x512xf32>,
    return
  }
  func.func @transform_0(%arg0: i32) -> (i32, i32) {
    %c0_i32 = arith.constant 0 : i32
    %c0_i32_0 = arith.constant 0 : i32
    return %c0_i32, %arg0 : i32, i32
  }
  func.func @transform_1(%arg0: i32) -> (i32, i32) {
    %c0_i32 = arith.constant 0 : i32
    %c0_i32_0 = arith.constant 0 : i32
    %c0_i32_1 = arith.constant 0 : i32
    return %c0_i32, %c0_i32_0 : i32, i32
  }
  func.func @transform_2(%arg0: i32) -> (i32, i32) {
    %c0_i32 = arith.constant 0 : i32
    %c0_i32_0 = arith.constant 0 : i32
    %c0_i32_1 = arith.constant 0 : i32
    return %c0_i32, %c0_i32_0 : i32, i32
  }
  func.func @transform_3(%arg0: i32) -> (i32, i32) {
    %c0_i32 = arith.constant 0 : i32
    %c0_i32_0 = arith.constant 0 : i32
    %c0_i32_1 = arith.constant 0 : i32
    return %c0_i32, %c0_i32_0 : i32, i32
  }
  func.func @transform_4(%arg0: i32) -> (i32, i32) {
    %c0_i32 = arith.constant 0 : i32
    %c0_i32_0 = arith.constant 0 : i32
    %c0_i32_1 = arith.constant 0 : i32
    return %c0_i32, %c0_i32_0 : i32, i32
  }
  func.func @transform_5(%arg0: i32) -> (i32, i32) {
    %c0_i32 = arith.constant 0 : i32
    %c0_i32_0 = arith.constant 0 : i32
    %c0_i32_1 = arith.constant 0 : i32
    return %c0_i32, %c0_i32_0 : i32, i32
  }
  func.func @transform_6(%arg0: i32) -> (i32, i32) {
    %c0_i32 = arith.constant 0 : i32
    %c0_i32_0 = arith.constant 0 : i32
    %c0_i32_1 = arith.constant 0 : i32
    return %c0_i32, %c0_i32_0 : i32, i32
  }
  func.func @transform_7(%arg0: i32) -> (i32, i32) {
    %c0_i32 = arith.constant 0 : i32
    %c0_i32_0 = arith.constant 0 : i32
    return %c0_i32, %arg0 : i32, i32
  }
}

</mosaic_0001>

<bundles_post_ra>
// kernel: net_forward.1
= control target key start
LH: loop header
LB: loop body
LE: loop exit
PB: predicated region body
PF: predicated region fallthrough
CT: control target
= control target key end

     0   :  { %s1797_s24 = smov 0   ;;  %s1799_s25 = smov 0   ;;  %s2579_s0 = inlined_call_operand.vmem [shape: bf16[9,1024], index: 0, kind: input, shape index: {}]   ;;  %s2580_s1 = inlined_call_operand.vmem [shape: bf16[256,9], index: 1, kind: input, shape index: {}]   ;;  %s2581_s2 = inlined_call_operand.vmem [shape: f32[256,1], index: 2, kind: input, shape index: {}]   ;;  %s2582_s3 = inlined_call_operand.vmem [shape: f32[8,256], index: 3, kind: input, shape index: {}]   ;;  %s2583_s4 = inlined_call_operand.vmem [shape: f32[8,1], index: 4, kind: input, shape index: {}]   ;;  %s2584_s5 = inlined_call_operand.vmem [shape: f32[2,8], index: 5, kind: input, shape index: {}]   ;;  %s2585_s6 = inlined_call_operand.vmem [shape: f32[2,1], index: 6, kind: input, shape index: {}]   ;;  %s2586_s7 = inlined_call_operand.vmem [shape: f32[2,1024], index: 7, kind: output, shape index: {}]  }
   0x1   :  { %s1801_s26 = smov 0  }
   0x2 LB: > { %s1520_s27 = sadd.s32 4294967295, %s1753_s26   ;;  %s1814_s28 = sadd.s32 1, %s1753_s26   ;;  %s1753_s26 = sphi %s1801_s26, %s2691_s26   ;;  %s1749_s25 = sphi %s1799_s25, %s2690_s25   ;;  %s1745_s24 = sphi %s1797_s24, %s2689_s24  }
   0x3   : > { %s21_s29 = ssub.s32 %s1753_s26, %s1814_s28  ;;  %s24_s30 = sadd.s32 1, %s1749_s25 }
   0x4   : > { %p22_p0 = scmp.eq.s32.totalorder %s21_s29, 0  ;;  %p31_p1 = scmp.ne.s32.totalorder %s1749_s25, %s1745_s24 }
   0x5   : > { %p32_p2 = scmp.eq.s32.totalorder %s1753_s26, 0  ;;  %p1523_p4 = scmp.ge.s32.totalorder %s1753_s26, 2 }
   0x6   : > { %s1823_s8 = scalar_select %p22_p0, %s1749_s25, %s24_s30  }
   0x7   : > { %p33_p3 = por %p32_p2, %p31_p1  ;;  %227 = sbr.rel (%p1523_p4) target bundleno = 20 (0x14), region = 40 }
   0xc   : > { %230 = sbr.rel (!%p33_p3) target bundleno = 20 (0x14), region = 44  ;;  %s232_s9 = sand.u32 (%p33_p3), 1, %s1749_s25  }
   0xd   : > { %s1681_s10 = sshll.u32 (%p33_p3), %s1753_s26, 4  ;;  %s1524_s11 = sshll.u32 (%p33_p3), %s232_s9, 5 }
   0xe   : > { %s237_s14 = scalar_lea.vmem (%p33_p3), %s2579_s0, %s1681_s10  ;;  %s234_s15 = scalar_lea.vmem (%p33_p3), [#allocation2], %s1524_s11 }
   0xf   : > { %v250_v0 = vld [vmem:[%s237_s14] sm:$0xff] (%p33_p3)  ;;  %v252_v1 = vld [vmem:[%s237_s14 + $0x8] sm:$0xff] (%p33_p3) }
  0x10   : > { %v254_v2 = vld [vmem:[%s237_s14 + $0x20] sm:$0xff] (%p33_p3)  ;;  %251 = vst [vmem:[%s234_s15] sm:$0xff] (%p33_p3), %v250_v0  ;;  %v256_v3 = vld [vmem:[%s237_s14 + $0x28] sm:$0xff] (%p33_p3) }
  0x11   : > { %253 = vst [vmem:[%s234_s15 + $0x8] sm:$0xff] %v252_v1 }
  0x12   : > { %255 = vst [vmem:[%s234_s15 + $0x10] sm:$0xff] %v254_v2 }
  0x13   : > { %257 = vst [vmem:[%s234_s15 + $0x18] sm:$0xff] %v256_v3 }
  0x14 PF: > { %p1527_p5 = scmp.ge.s32.totalorder %s1753_s26, 1  ;;  %p262_p6 = scmp.lt.s32.totalorder %s1753_s26, 3 }
  0x16   : > { %p263_p7 = pnand %p1527_p5, %p262_p6 }
  0x18   : > { %266 = sbr.rel (%p263_p7) target bundleno = 759 (0x2f7), region = 67 }
  0x1d   : > { %v375_v4 = vld [vmem:[%s2581_s2 + $0xf8] sm:$0xff]  ;;  %v374_v5 = vld [vmem:[%s2581_s2 + $0xf0] sm:$0xff]  ;;  %s269_s22 = sand.u32 1, %s1745_s24   ;;  %vm681_vm0 = vcmask 1043456   ;;  %v1755_v7 = vmov 0   ;;  %vm682_vm1 = vcmask 1044480  }
  0x1e   : > { %v359_v6 = vld [vmem:[%s2581_s2 + $0x78] sm:$0xff]  ;;  %1730 = vset.pattern.permute.xlu2 %v1755_v7  ;;  %1729 = vset.pattern.permute.xlu1 %v1755_v7  ;;  %s1528_s23 = sshll.u32 %s269_s22, 5  ;;  %v1756_v8 = vmov 65535   ;;  %v358_v27 = vld [vmem:[%s2581_s2 + $0x70] sm:$0xff]  ;;  %v357_v28 = vld [vmem:[%s2581_s2 + $0x68] sm:$0xff]  ;;  %vm632_vm2 = vcmask 72704  }
  0x1f   : > { %1728 = vset.pattern.permute.xlu0 %v1755_v7  ;;  %533 = vperm.xlu1 %1729, %v375_v4   ;;  %v683_v9 = vsel %vm681_vm0, 4294967295, %v1756_v8  ;;  %s271_s29 = scalar_lea.vmem [#allocation2], %s1528_s23  ;;  %v1682_v29 = vld [vmem:[%s2580_s1] sm:$0xff]  ;;  %v373_v31 = vld [vmem:[%s2581_s2 + $0xe8] sm:$0xff]  ;;  %v355_v32 = vld [vmem:[%s2581_s2 + $0x58] sm:$0xff]  ;;  %vm1360_vm3 = vcmask 64512  }
  0x20   : > { %528 = vperm.xlu2 %1730, %v374_v5   ;;  %453 = vperm.xlu0 %1728, %v359_v6   ;;  %v1597_v10 = vld [vmem:[%s271_s29] sm:$0xf]  ;;  %v1700_v11 = vld [vmem:[%s271_s29 + $0xc] sm:$0x10]  ;;  %v684_v12 = vsel %vm682_vm1, %v683_v9, 0  ;;  %v371_v34 = vld [vmem:[%s2581_s2 + $0xd8] sm:$0xff] }
  0x21   : > { %v1598_v13 = vor.u32 %v1700_v11, %v1597_v10  ;;  %v1698_v14 = vld [vmem:[%s271_s29 + $0x4] sm:$0xf]  ;;  %v1599_v15 = vld [vmem:[%s271_s29 + $0x10] sm:$0x10]  ;;  %v1605_v16 = vld [vmem:[%s271_s29 + $0x8] sm:$0xf] }
  0x22   : > { %v1602_v17 = vor.u32 %v1698_v14, %v1599_v15  ;;  %v1701_v18 = vld [vmem:[%s271_s29 + $0x14] sm:$0x10]  ;;  %v1699_v19 = vld [vmem:[%s271_s29 + $0xc] sm:$0xf]  ;;  %v1607_v20 = vld [vmem:[%s271_s29 + $0x18] sm:$0x10] }
  0x23   : > { %v686_v21 = vand.u32 %v1598_v13, %v684_v12  ;;  %v1606_v22 = vor.u32 %v1701_v18, %v1605_v16  ;;  %v1610_v23 = vor.u32 %v1699_v19, %v1607_v20  ;;  %v356_v30 = vld [vmem:[%s2581_s2 + $0x60] sm:$0xff]  ;;  %v354_v35 = vld [vmem:[%s2581_s2 + $0x50] sm:$0xff]  ;;  %v1683_v36 = vld [vmem:[%s2580_s1 + $0x8] sm:$0xff]  ;;  %s1529_s17 = sshll.u32 %s1520_s27, 2  ;;  %vm1451_vm4 = vcmask 1041408  }
  0x24   : > { %v689_v24 = vand.u32 %v1602_v17, %v684_v12  ;;  %v372_v33 = vld [vmem:[%s2581_s2 + $0xe0] sm:$0xff]  ;;  %v353_v37 = vld [vmem:[%s2581_s2 + $0x48] sm:$0xff]  ;;  %v370_v38 = vld [vmem:[%s2581_s2 + $0xd0] sm:$0xff]  ;;  %p302_p8 = scmp.lt.s32.totalorder %s1529_s17, 7  ;;  %vm1453_vm5 = vcmask 1045508  }
  0x25   : > { %704 = vmatpush.bf16.msra.mxu0 %v686_v21  ;;  %v692_v25 = vand.u32 %v1606_v22, %v684_v12  ;;  %v695_v26 = vand.u32 %v1610_v23, %v684_v12  ;;  %v352_v39 = vld [vmem:[%s2581_s2 + $0x40] sm:$0xff]  ;;  %v369_v40 = vld [vmem:[%s2581_s2 + $0xc8] sm:$0xff]  ;;  %v351_v42 = vld [vmem:[%s2581_s2 + $0x38] sm:$0xff] }
  0x26   : > { %793 = vmatpush.bf16.msra.mxu1 %v689_v24  ;;  %v368_v41 = vld [vmem:[%s2581_s2 + $0xc0] sm:$0xff]  ;;  %v1684_v43 = vld [vmem:[%s2580_s1 + $0x10] sm:$0xff]  ;;  %v367_v45 = vld [vmem:[%s2581_s2 + $0xb8] sm:$0xff]  ;;  %s2693_s17 = smov (!%p302_p8, %s1529_s17), 7 }
  0x27   : > { %882 = vmatpush.bf16.msra.mxu2 %v692_v25  ;;  %971 = vmatpush.bf16.msra.mxu3 %v695_v26  ;;  %v350_v44 = vld [vmem:[%s2581_s2 + $0x30] sm:$0xff]  ;;  %v349_v46 = vld [vmem:[%s2581_s2 + $0x28] sm:$0xff]  ;;  %v348_v49 = vld [vmem:[%s2581_s2 + $0x20] sm:$0xff]  ;;  %s1530_s18 = sshll.u32 %s2693_s17, 1 }
  0x28   : > { %448 = vperm.xlu0 %1728, %v358_v27   ;;  %443 = vperm.xlu1 %1729, %v357_v28   ;;  %v366_v47 = vld [vmem:[%s2581_s2 + $0xb0] sm:$0xff]  ;;  %v365_v48 = vld [vmem:[%s2581_s2 + $0xa8] sm:$0xff]  ;;  %v1685_v50 = vld [vmem:[%s2580_s1 + $0x18] sm:$0xff]  ;;  %s305_s27 = scalar_lea.vmem %s2586_s7, %s1530_s18 }
  0x29   : > { %438 = vperm.xlu2 %1730, %v356_v30   ;;  %1611 = vmatmul.msk.bf16.vlgmr.msra.gmra.mxu0 %vm632_vm2, %v1682_v29  ;;  %v347_v51 = vld [vmem:[%s2581_s2 + $0x18] sm:$0xff]  ;;  %v364_v52 = vld [vmem:[%s2581_s2 + $0xa0] sm:$0xff]  ;;  %v346_v53 = vld [vmem:[%s2581_s2 + $0x10] sm:$0xff] }
  0x2a   : > { %1627 = vmatmul.msk.bf16.vlgmr.msra.gmra.mxu1 %vm632_vm2, %v1682_v29  ;;  %1643 = vmatmul.msk.bf16.vlgmr.msra.gmra.mxu2 %vm632_vm2, %v1682_v29  ;;  %v363_v54 = vld [vmem:[%s2581_s2 + $0x98] sm:$0xff]  ;;  %v345_v55 = vld [vmem:[%s2581_s2 + $0x8] sm:$0xff]  ;;  %v1686_v56 = vld [vmem:[%s2580_s1 + $0x20] sm:$0xff] }
  0x2b   : > { %1659 = vmatmul.msk.bf16.vlgmr.msra.gmra.mxu3 %vm632_vm2, %v1682_v29  ;;  %v344_v57 = vld [vmem:[%s2581_s2] sm:$0xff]  ;;  %v1687_v58 = vld [vmem:[%s2580_s1 + $0x28] sm:$0xff]  ;;  %v1688_v59 = vld [vmem:[%s2580_s1 + $0x30] sm:$0xff] }
  0x2c   : > { %v362_v60 = vld [vmem:[%s2581_s2 + $0x90] sm:$0xff]  ;;  %v360_v61 = vld [vmem:[%s2581_s2 + $0x80] sm:$0xff]  ;;  %v1689_v62 = vld [vmem:[%s2580_s1 + $0x38] sm:$0xff] }
  0x2d   : > { %v361_v63 = vld [vmem:[%s2581_s2 + $0x88] sm:$0xff]  ;;  %v1690_v0 = vld [vmem:[%s2580_s1 + $0x40] sm:$0xff]  ;;  %v1692_v17 = vld [vmem:[%s2580_s1 + $0x50] sm:$0xff] }
  0x2e   : > { %v1691_v8 = vld [vmem:[%s2580_s1 + $0x48] sm:$0xff]  ;;  %v1693_v26 = vld [vmem:[%s2580_s1 + $0x58] sm:$0xff]  ;;  %v1354_v30 = vld [vmem:[%s2585_s6] sm:$0x3] }
  0x30   : > { %523 = vperm.xlu0 %1728, %v373_v31   ;;  %433 = vperm.xlu1 %1729, %v355_v32  }
  0x31   : > { %518 = vperm.xlu2 %1730, %v372_v33  }
  0x38   : > { %513 = vperm.xlu1 %1729, %v371_v34   ;;  %428 = vperm.xlu0 %1728, %v354_v35  }
  0x39   : > { %423 = vperm.xlu2 %1730, %v353_v37   ;;  %1612 = vmatmul.msk.bf16.gmra.mxu0 %vm632_vm2, %v1683_v36 }
  0x3a   : > { %1628 = vmatmul.msk.bf16.gmra.mxu1 %vm632_vm2, %v1683_v36  ;;  %1644 = vmatmul.msk.bf16.gmra.mxu2 %vm632_vm2, %v1683_v36 }
  0x3b   : > { %1660 = vmatmul.msk.bf16.gmra.mxu3 %vm632_vm2, %v1683_v36 }
  0x40   : > { %508 = vperm.xlu0 %1728, %v370_v38   ;;  %418 = vperm.xlu1 %1729, %v352_v39  }
  0x41   : > { %503 = vperm.xlu2 %1730, %v369_v40   ;;  %v1694_v40 = vld [vmem:[%s2580_s1 + $0x60] sm:$0xff] }
  0x48   : > { %498 = vperm.xlu1 %1729, %v368_v41   ;;  %413 = vperm.xlu0 %1728, %v351_v42  }
  0x49   : > { %408 = vperm.xlu2 %1730, %v350_v44   ;;  %1613 = vmatmul.msk.bf16.gmra.mxu0 %vm632_vm2, %v1684_v43 }
  0x4a   : > { %1629 = vmatmul.msk.bf16.gmra.mxu1 %vm632_vm2, %v1684_v43  ;;  %1645 = vmatmul.msk.bf16.gmra.mxu2 %vm632_vm2, %v1684_v43 }
  0x4b   : > { %1661 = vmatmul.msk.bf16.gmra.mxu3 %vm632_vm2, %v1684_v43 }
  0x50   : > { %493 = vperm.xlu0 %1728, %v367_v45   ;;  %403 = vperm.xlu1 %1729, %v349_v46  }
  0x51   : > { %488 = vperm.xlu2 %1730, %v366_v47  }
  0x58   : > { %483 = vperm.xlu1 %1729, %v365_v48   ;;  %398 = vperm.xlu0 %1728, %v348_v49  }
  0x59   : > { %393 = vperm.xlu2 %1730, %v347_v51   ;;  %1614 = vmatmul.msk.bf16.gmra.mxu0 %vm632_vm2, %v1685_v50 }
  0x5a   : > { %1630 = vmatmul.msk.bf16.gmra.mxu1 %vm632_vm2, %v1685_v50  ;;  %1646 = vmatmul.msk.bf16.gmra.mxu2 %vm632_vm2, %v1685_v50 }
  0x5b   : > { %1662 = vmatmul.msk.bf16.gmra.mxu3 %vm632_vm2, %v1685_v50 }
  0x60   : > { %478 = vperm.xlu0 %1728, %v364_v52   ;;  %388 = vperm.xlu1 %1729, %v346_v53   ;;  %v1695_v53 = vld [vmem:[%s2580_s1 + $0x68] sm:$0xff] }
  0x61   : > { %473 = vperm.xlu2 %1730, %v363_v54  }
  0x68   : > { %383 = vperm.xlu0 %1728, %v345_v55   ;;  %468 = vperm.xlu1 %1729, %v362_v60  }
  0x69   : > { %378 = vperm.xlu2 %1730, %v344_v57   ;;  %1615 = vmatmul.msk.bf16.gmra.mxu0 %vm632_vm2, %v1686_v56 }
  0x6a   : > { %1631 = vmatmul.msk.bf16.gmra.mxu1 %vm632_vm2, %v1686_v56  ;;  %1647 = vmatmul.msk.bf16.gmra.mxu2 %vm632_vm2, %v1686_v56 }
  0x6b   : > { %1663 = vmatmul.msk.bf16.gmra.mxu3 %vm632_vm2, %v1686_v56 }
  0x70   : > { %458 = vperm.xlu1 %1729, %v360_v61   ;;  %463 = vperm.xlu0 %1728, %v361_v63  }
  0x78   : > { %1357 = vperm.xlu0 %1728, %v1354_v30  }
  0x79   : > { %1616 = vmatmul.msk.bf16.gmra.mxu0 %vm632_vm2, %v1687_v58 }
  0x7a   : > { %1632 = vmatmul.msk.bf16.gmra.mxu1 %vm632_vm2, %v1687_v58  ;;  %1648 = vmatmul.msk.bf16.gmra.mxu2 %vm632_vm2, %v1687_v58  ;;  %v2072_v32 = vpop.permute.xlu2 %528 }
  0x7b   : > { %1664 = vmatmul.msk.bf16.gmra.mxu3 %vm632_vm2, %v1687_v58  ;;  %2609 = vst [vmem:[#allocation15_spill] sm:$0xff] %v2072_v32 }
  0x83   : > { %v2095_v43 = vpop.permute.xlu2 %438 }
  0x89   : > { %1617 = vmatmul.msk.bf16.gmra.mxu0 %vm632_vm2, %v1688_v59 }
  0x8a   : > { %1633 = vmatmul.msk.bf16.gmra.mxu1 %vm632_vm2, %v1688_v59  ;;  %1649 = vmatmul.msk.bf16.gmra.mxu2 %vm632_vm2, %v1688_v59 }
  0x8b   : > { %1665 = vmatmul.msk.bf16.gmra.mxu3 %vm632_vm2, %v1688_v59  ;;  %v2115_v51 = vpop.permute.xlu2 %518  ;;  %v1183_v59 = vld [vmem:[%s2583_s4] sm:$0xff] }
  0x8c   : > { %2618 = vst [vmem:[#allocation24_spill] sm:$0xff] %v2115_v51  ;;  %1186 = vperm.xlu2 %1730, %v1183_v59  }
  0x91   : > { %v2082_v37 = vpop.permute.xlu1 %533 }
  0x92   : > { %v2069_v31 = vpop.permute.xlu0 %453  ;;  %2612 = vst [vmem:[#allocation18_spill] sm:$0xff] %v2082_v37 }
  0x93   : > { %v2138_v60 = vpop.permute.xlu2 %423 }
  0x99   : > { %1618 = vmatmul.msk.bf16.gmra.mxu0 %vm632_vm2, %v1689_v62 }
  0x9a   : > { %1634 = vmatmul.msk.bf16.gmra.mxu1 %vm632_vm2, %v1689_v62  ;;  %1650 = vmatmul.msk.bf16.gmra.mxu2 %vm632_vm2, %v1689_v62  ;;  %v2084_v38 = vpop.permute.xlu0 %448  ;;  %v2103_v45 = vpop.permute.xlu1 %443 }
  0x9b   : > { %1666 = vmatmul.msk.bf16.gmra.mxu3 %vm632_vm2, %v1689_v62 }
  0xa2   : > { %v2111_v49 = vpop.permute.xlu0 %523  ;;  %v2126_v56 = vpop.permute.xlu1 %433 }
  0xa3   : > { %2617 = vst [vmem:[#allocation23_spill] sm:$0xff] %v2111_v49 }
  0xa6   : > { %v1990_v1 = vpop.f32.mrf.mxu0 }
  0xa7   : > { %v1992_v2 = vpop.f32.mrf.mxu1 }
  0xa9   : > { %1619 = vmatmul.msk.bf16.gmra.mxu0 %vm632_vm2, %v1690_v0 }
  0xaa   : > { %1635 = vmatmul.msk.bf16.gmra.mxu1 %vm632_vm2, %v1690_v0  ;;  %1651 = vmatmul.msk.bf16.gmra.mxu2 %vm632_vm2, %v1690_v0  ;;  %v2130_v58 = vpop.permute.xlu0 %428 }
  0xab   : > { %1667 = vmatmul.msk.bf16.gmra.mxu3 %vm632_vm2, %v1690_v0 }
  0xad   : > { %v1998_v3 = vpop.f32.mrf.mxu2 }
  0xae   : > { %2597 = vst [vmem:[#allocation3_spill] sm:$0xff] %v1998_v3  ;;  %v2000_v4 = vpop.f32.mrf.mxu3  ;;  %v2002_v5 = vpop.f32.mrf.mxu0 }
  0xaf   : > { %2598 = vst [vmem:[#allocation4_spill] sm:$0xff] %v2000_v4  ;;  %v2004_v6 = vpop.f32.mrf.mxu1 }
  0xb5   : > { %v2006_v7 = vpop.f32.mrf.mxu2 }
  0xb6   : > { %2599 = vst [vmem:[#allocation5_spill] sm:$0xff] %v2006_v7  ;;  %v2011_v9 = vpop.f32.mrf.mxu3  ;;  %v2013_v10 = vpop.f32.mrf.mxu0  ;;  %v1697_v7 = vld [vmem:[%s2580_s1 + $0x78] sm:$0xff] }
  0xb7   : > { %2600 = vst [vmem:[#allocation6_spill] sm:$0xff] %v2011_v9  ;;  %v2015_v11 = vpop.f32.mrf.mxu1 }
  0xb9   : > { %1620 = vmatmul.msk.bf16.gmra.mxu0 %vm632_vm2, %v1691_v8 }
  0xba   : > { %1636 = vmatmul.msk.bf16.gmra.mxu1 %vm632_vm2, %v1691_v8  ;;  %1652 = vmatmul.msk.bf16.gmra.mxu2 %vm632_vm2, %v1691_v8 }
  0xbb   : > { %1668 = vmatmul.msk.bf16.gmra.mxu3 %vm632_vm2, %v1691_v8  ;;  %v2145_v8 = vpop.permute.xlu1 %513 }
  0xbc   : > { %2623 = vst [vmem:[#allocation29_spill] sm:$0xff] %v2145_v8 }
  0xbd   : > { %v2021_v12 = vpop.f32.mrf.mxu2 }
  0xbe   : > { %2601 = vst [vmem:[#allocation7_spill] sm:$0xff] %v2021_v12  ;;  %v2023_v13 = vpop.f32.mrf.mxu3  ;;  %v2025_v14 = vpop.f32.mrf.mxu0 }
  0xbf   : > { %2602 = vst [vmem:[#allocation8_spill] sm:$0xff] %v2023_v13  ;;  %v2027_v15 = vpop.f32.mrf.mxu1 }
  0xc3   : > { %v2161_v8 = vpop.permute.xlu1 %418 }
  0xc5   : > { %v2029_v16 = vpop.f32.mrf.mxu2 }
  0xc6   : > { %2603 = vst [vmem:[#allocation9_spill] sm:$0xff] %v2029_v16  ;;  %v2034_v18 = vpop.f32.mrf.mxu3  ;;  %v2036_v19 = vpop.f32.mrf.mxu0 }
  0xc7   : > { %2604 = vst [vmem:[#allocation10_spill] sm:$0xff] %v2034_v18  ;;  %v2038_v20 = vpop.f32.mrf.mxu1 }
  0xc9   : > { %1621 = vmatmul.msk.bf16.gmra.mxu0 %vm632_vm2, %v1692_v17 }
  0xca   : > { %1637 = vmatmul.msk.bf16.gmra.mxu1 %vm632_vm2, %v1692_v17  ;;  %1653 = vmatmul.msk.bf16.gmra.mxu2 %vm632_vm2, %v1692_v17 }
  0xcb   : > { %1669 = vmatmul.msk.bf16.gmra.mxu3 %vm632_vm2, %v1692_v17  ;;  %v2147_v17 = vpop.permute.xlu0 %508  ;;  %v2172_v3 = vpop.permute.xlu1 %498 }
  0xcc   : > { %2624 = vst [vmem:[#allocation30_spill] sm:$0xff] %v2147_v17 }
  0xcd   : > { %v2044_v21 = vpop.f32.mrf.mxu2  ;;  %2626 = vst [vmem:[#allocation32_spill] sm:$0xff] %v2172_v3 }
  0xce   : > { %2605 = vst [vmem:[#allocation11_spill] sm:$0xff] %v2044_v21  ;;  %v2046_v22 = vpop.f32.mrf.mxu3  ;;  %v2048_v23 = vpop.f32.mrf.mxu0 }
  0xcf   : > { %2606 = vst [vmem:[#allocation12_spill] sm:$0xff] %v2046_v22  ;;  %v2050_v24 = vpop.f32.mrf.mxu1 }
  0xd5   : > { %v2052_v25 = vpop.f32.mrf.mxu2 }
  0xd6   : > { %2607 = vst [vmem:[#allocation13_spill] sm:$0xff] %v2052_v25  ;;  %v2057_v27 = vpop.f32.mrf.mxu3  ;;  %v2059_v28 = vpop.f32.mrf.mxu0 }
  0xd7   : > { %2608 = vst [vmem:[#allocation14_spill] sm:$0xff] %v2057_v27  ;;  %v2061_v29 = vpop.f32.mrf.mxu1 }
  0xd9   : > { %1622 = vmatmul.msk.bf16.gmra.mxu0 %vm632_vm2, %v1693_v26 }
  0xda   : > { %1638 = vmatmul.msk.bf16.gmra.mxu1 %vm632_vm2, %v1693_v26  ;;  %1654 = vmatmul.msk.bf16.gmra.mxu2 %vm632_vm2, %v1693_v26 }
  0xdb   : > { %1670 = vmatmul.msk.bf16.gmra.mxu3 %vm632_vm2, %v1693_v26  ;;  %v2149_v26 = vpop.permute.xlu2 %503 }
  0xdc   : > { %2625 = vst [vmem:[#allocation31_spill] sm:$0xff] %v2149_v26  ;;  %v2164_v26 = vpop.permute.xlu0 %413 }
  0xdd   : > { %v2074_v33 = vpop.f32.mrf.mxu2 }
  0xde   : > { %2610 = vst [vmem:[#allocation16_spill] sm:$0xff] %v2074_v33  ;;  %v2076_v34 = vpop.f32.mrf.mxu3  ;;  %v2078_v35 = vpop.f32.mrf.mxu0 }
  0xdf   : > { %2611 = vst [vmem:[#allocation17_spill] sm:$0xff] %v2076_v34  ;;  %v2080_v36 = vpop.f32.mrf.mxu1  ;;  %v2195_v34 = vpop.permute.xlu1 %403 }
  0xe3   : > { %v2170_v32 = vpop.permute.xlu2 %408 }
  0xe4   : > { %v2181_v12 = vpop.permute.xlu0 %493 }
  0xe5   : > { %v2086_v39 = vpop.f32.mrf.mxu2  ;;  %2627 = vst [vmem:[#allocation33_spill] sm:$0xff] %v2181_v12 }
  0xe6   : > { %2613 = vst [vmem:[#allocation19_spill] sm:$0xff] %v2086_v39  ;;  %v2091_v41 = vpop.f32.mrf.mxu3  ;;  %v2093_v42 = vpop.f32.mrf.mxu0 }
  0xe7   : > { %2614 = vst [vmem:[#allocation20_spill] sm:$0xff] %v2091_v41  ;;  %v2097_v44 = vpop.f32.mrf.mxu1 }
  0xe9   : > { %1623 = vmatmul.msk.bf16.gmra.mxu0 %vm632_vm2, %v1694_v40 }
  0xea   : > { %1639 = vmatmul.msk.bf16.gmra.mxu1 %vm632_vm2, %v1694_v40  ;;  %1655 = vmatmul.msk.bf16.gmra.mxu2 %vm632_vm2, %v1694_v40 }
  0xeb   : > { %1671 = vmatmul.msk.bf16.gmra.mxu3 %vm632_vm2, %v1694_v40  ;;  %v1696_v40 = vld [vmem:[%s2580_s1 + $0x70] sm:$0xff]  ;;  %v2183_v16 = vpop.permute.xlu2 %488 }
  0xec   : > { %2628 = vst [vmem:[#allocation34_spill] sm:$0xff] %v2183_v16  ;;  %v2199_v41 = vpop.permute.xlu0 %398 }
  0xed   : > { %v2105_v46 = vpop.f32.mrf.mxu2 }
  0xee   : > { %2615 = vst [vmem:[#allocation21_spill] sm:$0xff] %v2105_v46  ;;  %v2107_v47 = vpop.f32.mrf.mxu3  ;;  %v2109_v48 = vpop.f32.mrf.mxu0 }
  0xef   : > { %2616 = vst [vmem:[#allocation22_spill] sm:$0xff] %v2107_v47  ;;  %v2113_v50 = vpop.f32.mrf.mxu1 }
  0xf5   : > { %v2117_v52 = vpop.f32.mrf.mxu2 }
  0xf6   : > { %2619 = vst [vmem:[#allocation25_spill] sm:$0xff] %v2117_v52  ;;  %v2122_v54 = vpop.f32.mrf.mxu3  ;;  %v2124_v55 = vpop.f32.mrf.mxu0 }
  0xf7   : > { %2620 = vst [vmem:[#allocation26_spill] sm:$0xff] %v2122_v54  ;;  %v2128_v57 = vpop.f32.mrf.mxu1  ;;  %v2203_v54 = vpop.permute.xlu2 %393 }
  0xf9   : > { %1624 = vmatmul.msk.bf16.gmra.mxu0 %vm632_vm2, %v1695_v53 }
  0xfa   : > { %1640 = vmatmul.msk.bf16.gmra.mxu1 %vm632_vm2, %v1695_v53  ;;  %1656 = vmatmul.msk.bf16.gmra.mxu2 %vm632_vm2, %v1695_v53 }
  0xfb   : > { %1672 = vmatmul.msk.bf16.gmra.mxu3 %vm632_vm2, %v1695_v53 }
  0xfd   : > { %v2141_v61 = vpop.f32.mrf.mxu2 }
  0xfe   : > { %2621 = vst [vmem:[#allocation27_spill] sm:$0xff] %v2141_v61  ;;  %v2143_v62 = vpop.f32.mrf.mxu3  ;;  %v733_v63 = vpop.f32.mrf.mxu0 }
  0xff   : > { %2622 = vst [vmem:[#allocation28_spill] sm:$0xff] %v2143_v62  ;;  %v822_v0 = vpop.f32.mrf.mxu1 }
 0x105   : > { %v2151_v30 = vpop.f32.mrf.mxu2 }
 0x106   : > { %v2156_v53 = vpop.f32.mrf.mxu3  ;;  %v736_v59 = vpop.f32.mrf.mxu0 }
 0x107   : > { %v825_v51 = vpop.f32.mrf.mxu1 }
 0x108   : > { %v826_v52 = vadd.f32 %v825_v51, %v2095_v43 }
 0x109   : > { %1625 = vmatmul.msk.bf16.gmra.mxu0 %vm632_vm2, %v1696_v40 }
 0x10a   : > { %1641 = vmatmul.msk.bf16.gmra.mxu1 %vm632_vm2, %v1696_v40  ;;  %1657 = vmatmul.msk.bf16.gmra.mxu2 %vm632_vm2, %v1696_v40  ;;  %v1102_v51 = vmax.f32 %v826_v52, 0.0 }
 0x10b   : > { %1673 = vmatmul.msk.bf16.gmra.mxu3 %vm632_vm2, %v1696_v40 }
 0x10d   : > { %v2166_v17 = vpop.f32.mrf.mxu2 }
 0x10e   : > { %v2168_v49 = vpop.f32.mrf.mxu3  ;;  %v738_v37 = vpop.f32.mrf.mxu0 }
 0x10f   : > { %v827_v4 = vpop.f32.mrf.mxu1 }
 0x110   : > { %v828_v47 = vadd.f32 %v827_v4, %v2103_v45 }
 0x112   : > { %v1106_v4 = vmax.f32 %v828_v47, 0.0  ;;  %v729_v47 = vadd.f32 %v2109_v48, %v2138_v60 }
 0x115   : > { %v2174_v9 = vpop.f32.mrf.mxu2 }
 0x116   : > { %v2179_v13 = vpop.f32.mrf.mxu3  ;;  %v741_v40 = vpop.f32.mrf.mxu0 }
 0x117   : > { %v830_v18 = vpop.f32.mrf.mxu1  ;;  %v742_v27 = vadd.f32 %v741_v40, %v2084_v38  ;;  %v737_v40 = vadd.f32 %v736_v59, %v2095_v43  ;;  %v2227_v59 = vpop.permute.xlu0 %478 }
 0x118   : > { %v831_v16 = vadd.f32 %v830_v18, %v2084_v38  ;;  %v734_v18 = vadd.f32 %v733_v63, %v2126_v56 }
 0x119   : > { %1626 = vmatmul.msk.bf16.gmra.mxu0 %vm632_vm2, %v1697_v7 }
 0x11a   : > { %1642 = vmatmul.msk.bf16.gmra.mxu1 %vm632_vm2, %v1697_v7  ;;  %1658 = vmatmul.msk.bf16.gmra.mxu2 %vm632_vm2, %v1697_v7  ;;  %v1110_v62 = vmax.f32 %v831_v16, 0.0  ;;  %v1097_v63 = vmax.f32 %v734_v18, 0.0  ;;  %v1089_v18 = vmax.f32 %v729_v47, 0.0  ;;  %v808_v47 = vadd.f32 %v2050_v24, %v2195_v34 }
 0x11b   : > { %1674 = vmatmul.msk.bf16.gmra.mxu3 %vm632_vm2, %v1697_v7  ;;  %v739_v7 = vadd.f32 %v738_v37, %v2103_v45 }
 0x11d   : > { %v2189_v3 = vpop.f32.mrf.mxu2 }
 0x11e   : > { %v2191_v22 = vpop.f32.mrf.mxu3  ;;  %v743_v21 = vpop.f32.mrf.mxu0 }
 0x11f   : > { %v744_v12 = vadd.f32 %v743_v21, %v2069_v31  ;;  %v832_v25 = vpop.f32.mrf.mxu1  ;;  %v1109_v21 = vmax.f32 %v742_v27, 0.0  ;;  %v732_v27 = vadd.f32 %v2124_v55, %v2130_v58 }
 0x120   : > { %v833_v33 = vadd.f32 %v832_v25, %v2069_v31  ;;  %v1105_v25 = vmax.f32 %v739_v7, 0.0  ;;  %v727_v7 = vadd.f32 %v2093_v42, %v2161_v8 }
 0x121   : > { %v1113_v39 = vmax.f32 %v744_v12, 0.0  ;;  %v823_v12 = vadd.f32 %v822_v0, %v2126_v56  ;;  %v818_v0 = vadd.f32 %v2113_v50, %v2138_v60  ;;  %v1093_v52 = vmax.f32 %v732_v27, 0.0 }
 0x122   : > { %v1114_v46 = vmax.f32 %v833_v33, 0.0 }
 0x123   : > { %1189 = vmatpush.msrb.mxu0 %v1113_v39  ;;  %v1101_v39 = vmax.f32 %v737_v40, 0.0  ;;  %v1098_v55 = vmax.f32 %v823_v12, 0.0  ;;  %v2233_v40 = vpop.permute.xlu2 %473 }
 0x124   : > { %1229 = vmatpush.msrb.mxu2 %v1114_v46  ;;  %v821_v46 = vadd.f32 %v2128_v57, %v2130_v58  ;;  %v816_v57 = vadd.f32 %v2097_v44, %v2161_v8  ;;  %v1090_v44 = vmax.f32 %v818_v0, 0.0  ;;  %v717_v0 = vadd.f32 %v2036_v19, %v2199_v41 }
 0x125   : > { %v2208_v61 = vpop.f32.mrf.mxu2  ;;  %1190 = vmatpush.msrb.mxu0 %v1109_v21  ;;  %v724_v21 = vadd.f32 %v2078_v35, %v2164_v26  ;;  %v1085_v35 = vmax.f32 %v727_v7, 0.0  ;;  %v806_v7 = vadd.f32 %v2038_v20, %v2199_v41 }
 0x126   : > { %v2211_v33 = vpop.f32.mrf.mxu3  ;;  %1230 = vmatpush.msrb.mxu2 %v1110_v62  ;;  %v2213_v37 = vpop.f32.mrf.mxu0  ;;  %v1094_v48 = vmax.f32 %v821_v46, 0.0  ;;  %v1086_v46 = vmax.f32 %v816_v57, 0.0  ;;  %v1069_v20 = vmax.f32 %v717_v0, 0.0 }
 0x127   : > { %v2217_v16 = vpop.f32.mrf.mxu1  ;;  %1191 = vmatpush.msrb.mxu0 %v1105_v25  ;;  %v2223_v62 = vpop.permute.xlu1 %483  ;;  %v813_v25 = vadd.f32 %v2080_v36, %v2164_v26  ;;  %v719_v36 = vadd.f32 %v2048_v23, %v2195_v34  ;;  %v714_v23 = vadd.f32 %v2025_v14, %v2203_v54 }
 0x128   : > { %1231 = vmatpush.msrb.mxu2 %v1106_v4  ;;  %v722_v4 = vadd.f32 %v2059_v28, %v2170_v32 }
 0x129   : > { %1192 = vmatpush.msrb.mxu0 %v1101_v39  ;;  %v811_v39 = vadd.f32 %v2061_v29, %v2170_v32  ;;  %v1073_v57 = vmax.f32 %v719_v36, 0.0 }
 0x12a   : > { %1232 = vmatpush.msrb.mxu2 %v1102_v51  ;;  %v1081_v51 = vmax.f32 %v724_v21, 0.0  ;;  %v1077_v28 = vmax.f32 %v722_v4, 0.0  ;;  %v1070_v4 = vmax.f32 %v806_v7, 0.0  ;;  %v920_v7 = vadd.f32 %v2189_v3, %v2084_v38 }
 0x12b   : > { %1193 = vmatpush.msrb.mxu0 %v1097_v63  ;;  %v1082_v63 = vmax.f32 %v813_v25, 0.0  ;;  %v1078_v29 = vmax.f32 %v811_v39, 0.0  ;;  %v1006_v3 = vadd.f32 %v2179_v13, %v2103_v45 }
 0x12c   : > { %1233 = vmatpush.msrb.mxu2 %v1098_v55 }
 0x12d   : > { %v2237_v50 = vpop.f32.mrf.mxu2  ;;  %1194 = vmatpush.msrb.mxu0 %v1093_v52  ;;  %v2263_v52 = vpop.permute.xlu0 %383 }
 0x12e   : > { %2629 = vst [vmem:[#allocation35_spill] sm:$0xff] %v2237_v50  ;;  %v2241_v42 = vpop.f32.mrf.mxu3  ;;  %1234 = vmatpush.msrb.mxu2 %v1094_v48  ;;  %v2243_v12 = vpop.f32.mrf.mxu0  ;;  %v803_v48 = vadd.f32 %v2027_v15, %v2203_v54  ;;  %v709_v39 = vadd.f32 %v2002_v5, %v2263_v52  ;;  %v798_v36 = vadd.f32 %v2004_v6, %v2263_v52 }
 0x12f   : > { %2630 = vst [vmem:[#allocation36_spill] sm:$0xff] %v2241_v42  ;;  %v2247_v27 = vpop.f32.mrf.mxu1  ;;  %1195 = vmatpush.msrb.mxu0 %v1089_v18  ;;  %v2257_v55 = vpop.permute.xlu1 %388  ;;  %v1074_v18 = vmax.f32 %v808_v47, 0.0  ;;  %v1011_v6 = vadd.f32 %v2211_v33, %v2069_v31 }
 0x130   : > { %1235 = vmatpush.msrb.mxu2 %v1090_v44  ;;  %v712_v14 = vadd.f32 %v2013_v10, %v2257_v55  ;;  %v2277_v44 = vpop.permute.xlu2 %378  ;;  %v801_v15 = vadd.f32 %v2015_v11, %v2257_v55  ;;  %v1057_v5 = vmax.f32 %v709_v39, 0.0 }
 0x131   : > { %1196 = vmatpush.msrb.mxu0 %v1085_v35  ;;  %v1065_v35 = vmax.f32 %v714_v23, 0.0  ;;  %v707_v10 = vadd.f32 %v1990_v1, %v2277_v44  ;;  %v796_v11 = vadd.f32 %v1992_v2, %v2277_v44  ;;  %v1058_v1 = vmax.f32 %v798_v36, 0.0  ;;  %v2306_v23 = vld [vmem:[%s2582_s3] sm:$0xff] }
 0x132   : > { %1236 = vmatpush.msrb.mxu2 %v1086_v46  ;;  %v1066_v46 = vmax.f32 %v803_v48, 0.0  ;;  %v1062_v47 = vmax.f32 %v801_v15, 0.0 }
 0x133   : > { %1197 = vmatpush.msrb.mxu0 %v1081_v51  ;;  %v1061_v51 = vmax.f32 %v712_v14, 0.0  ;;  %v1054_v33 = vmax.f32 %v796_v11, 0.0  ;;  %v1111_v14 = vmax.f32 %v920_v7, 0.0  ;;  %v2642_v7 = vld [vmem:[#allocation22_spill] sm:$0xff] }
 0x134   : > { %1237 = vmatpush.msrb.mxu2 %v1082_v63  ;;  %v922_v63 = vadd.f32 %v2208_v61, %v2069_v31  ;;  %v1053_v61 = vmax.f32 %v707_v10, 0.0  ;;  %v1009_v31 = vadd.f32 %v2191_v22, %v2084_v38  ;;  %v1004_v22 = vadd.f32 %v2168_v49, %v2095_v43 }
 0x135   : > { %v2265_v24 = vpop.f32.mrf.mxu2  ;;  %1198 = vmatpush.msrb.mxu0 %v1077_v28  ;;  %v912_v38 = vadd.f32 %v2151_v30, %v2126_v56  ;;  %v2638_v30 = vld [vmem:[#allocation28_spill] sm:$0xff] }
 0x136   : > { %2631 = vst [vmem:[#allocation37_spill] sm:$0xff] %v2265_v24  ;;  %v2269_v19 = vpop.f32.mrf.mxu3  ;;  %1238 = vmatpush.msrb.mxu2 %v1078_v29  ;;  %v2271_v21 = vpop.f32.mrf.mxu0  ;;  %v1115_v48 = vmax.f32 %v922_v63, 0.0  ;;  %v999_v36 = vadd.f32 %v2638_v30, %v2130_v58  ;;  %v2667_v24 = vld [vmem:[#allocation23_spill] sm:$0xff] }
 0x137   : > { %2632 = vst [vmem:[#allocation38_spill] sm:$0xff] %v2269_v19  ;;  %v2273_v25 = vpop.f32.mrf.mxu1  ;;  %1199 = vmatpush.msrb.mxu0 %v1073_v57  ;;  %v917_v57 = vadd.f32 %v2174_v9, %v2103_v45  ;;  %v1112_v9 = vmax.f32 %v1009_v31, 0.0  ;;  %v1099_v10 = vmax.f32 %v912_v38, 0.0  ;;  %v2643_v31 = vld [vmem:[#allocation19_spill] sm:$0xff] }
 0x138   : > { %1239 = vmatpush.msrb.mxu2 %v1074_v18  ;;  %v1116_v18 = vmax.f32 %v1011_v6, 0.0 }
 0x139   : > { %1200 = vmatpush.msrb.mxu0 %v1069_v20  ;;  %v915_v20 = vadd.f32 %v2166_v17, %v2095_v43  ;;  %v1107_v13 = vmax.f32 %v917_v57, 0.0  ;;  %v1108_v17 = vmax.f32 %v1006_v3, 0.0  ;;  %v2637_v43 = vld [vmem:[#allocation27_spill] sm:$0xff] }
 0x13a   : > { %1240 = vmatpush.msrb.mxu2 %v1070_v4  ;;  %v1001_v4 = vadd.f32 %v2156_v53, %v2126_v56  ;;  %v910_v49 = vadd.f32 %v2637_v43, %v2130_v58  ;;  %v2639_v56 = vld [vmem:[#allocation25_spill] sm:$0xff]  ;;  %v994_v58 = vadd.f32 %v2642_v7, %v2161_v8 }
 0x13b   : > { %1201 = vmatpush.msrb.mxu0 %v1065_v35  ;;  %v1103_v39 = vmax.f32 %v915_v20, 0.0  ;;  %v907_v53 = vadd.f32 %v2639_v56, %v2138_v60 }
 0x13c   : > { %1241 = vmatpush.msrb.mxu2 %v1066_v46  ;;  %v1100_v63 = vmax.f32 %v1001_v4, 0.0 }
 0x13d   : > { %v2291_v28 = vpop.f32.mrf.mxu2  ;;  %1202 = vmatpush.msrb.mxu0 %v1061_v51  ;;  %v1104_v51 = vmax.f32 %v1004_v22, 0.0  ;;  %v1091_v57 = vmax.f32 %v907_v53, 0.0 }
 0x13e   : > { %2633 = vst [vmem:[#allocation39_spill] sm:$0xff] %v2291_v28  ;;  %v2295_v0 = vpop.f32.mrf.mxu3  ;;  %1242 = vmatpush.msrb.mxu2 %v1062_v47  ;;  %v2297_v29 = vpop.f32.mrf.mxu0  ;;  %v2640_v47 = vld [vmem:[#allocation26_spill] sm:$0xff] }
 0x13f   : > { %2634 = vst [vmem:[#allocation40_spill] sm:$0xff] %v2295_v0  ;;  %v2301_v2 = vpop.f32.mrf.mxu1  ;;  %1203 = vmatpush.msrb.mxu0 %v1057_v5  ;;  %v996_v11 = vadd.f32 %v2640_v47, %v2138_v60  ;;  %v2641_v5 = vld [vmem:[#allocation21_spill] sm:$0xff]  ;;  %v2645_v60 = vld [vmem:[#allocation20_spill] sm:$0xff] }
 0x140   : > { %1243 = vmatpush.msrb.mxu2 %v1058_v1  ;;  %v905_v6 = vadd.f32 %v2641_v5, %v2161_v8  ;;  %v1095_v1 = vmax.f32 %v910_v49, 0.0  ;;  %v991_v3 = vadd.f32 %v2645_v60, %v2164_v26  ;;  %v2647_v8 = vld [vmem:[#allocation16_spill] sm:$0xff] }
 0x141   : > { %1204 = vmatpush.msrb.mxu0 %v1053_v61  ;;  %v1096_v61 = vmax.f32 %v999_v36, 0.0  ;;  %v900_v22 = vadd.f32 %v2647_v8, %v2170_v32  ;;  %v2659_v8 = vld [vmem:[#allocation5_spill] sm:$0xff] }
 0x142   : > { %1244 = vmatpush.msrb.mxu2 %v1054_v33  ;;  %1205 = vmatmul.f32.vlgmr.msrb.gmra.mxu0 %v2306_v23  ;;  %v902_v33 = vadd.f32 %v2643_v31, %v2164_v26  ;;  %v2649_v26 = vld [vmem:[#allocation13_spill] sm:$0xff]  ;;  %v1084_v36 = vmax.f32 %v991_v3, 0.0  ;;  %v2658_v3 = vld [vmem:[#allocation8_spill] sm:$0xff] }
 0x143   : > { %1245 = vmatmul.f32.vlgmr.msrb.gmra.mxu2 %v2306_v23  ;;  %1269 = vmatpush.msra.mxu0 %v1115_v48  ;;  %v897_v43 = vadd.f32 %v2649_v26, %v2195_v34  ;;  %v1079_v53 = vmax.f32 %v900_v22, 0.0  ;;  %v887_v22 = vadd.f32 %v2659_v8, %v2263_v52  ;;  %v2661_v26 = vld [vmem:[#allocation3_spill] sm:$0xff] }
 0x144   : > { %1309 = vmatpush.msra.mxu2 %v1116_v18  ;;  %v1092_v18 = vmax.f32 %v996_v11, 0.0  ;;  %v1083_v49 = vmax.f32 %v902_v33, 0.0  ;;  %v2653_v11 = vld [vmem:[#allocation9_spill] sm:$0xff]  ;;  %v2657_v33 = vld [vmem:[#allocation7_spill] sm:$0xff] }
 0x145   : > { %v2322_v45 = vpop.f32.mrf.mxu2  ;;  %1270 = vmatpush.msra.mxu0 %v1111_v14  ;;  %v1075_v5 = vmax.f32 %v897_v43, 0.0  ;;  %v885_v43 = vadd.f32 %v2661_v26, %v2277_v44 }
 0x146   : > { %2635 = vst [vmem:[#allocation41_spill] sm:$0xff] %v2322_v45  ;;  %v2326_v15 = vpop.f32.mrf.mxu3  ;;  %1310 = vmatpush.msra.mxu2 %v1112_v9  ;;  %v2328_v35 = vpop.f32.mrf.mxu0  ;;  %v1087_v9 = vmax.f32 %v905_v6, 0.0  ;;  %v2654_v6 = vld [vmem:[#allocation10_spill] sm:$0xff] }
 0x147   : > { %2636 = vst [vmem:[#allocation42_spill] sm:$0xff] %v2326_v15  ;;  %v2332_v46 = vpop.f32.mrf.mxu1  ;;  %1271 = vmatpush.msra.mxu0 %v1107_v13  ;;  %v2648_v13 = vld [vmem:[#allocation17_spill] sm:$0xff] }
 0x148   : > { %1311 = vmatpush.msra.mxu2 %v1108_v17  ;;  %v989_v4 = vadd.f32 %v2648_v13, %v2170_v32  ;;  %v1088_v17 = vmax.f32 %v994_v58, 0.0  ;;  %v2660_v13 = vld [vmem:[#allocation6_spill] sm:$0xff] }
 0x149   : > { %1272 = vmatpush.msra.mxu0 %v1103_v39  ;;  %v2650_v39 = vld [vmem:[#allocation14_spill] sm:$0xff] }
 0x14a   : > { %1312 = vmatpush.msra.mxu2 %v1104_v51  ;;  %v986_v30 = vadd.f32 %v2650_v39, %v2195_v34  ;;  %v2651_v51 = vld [vmem:[#allocation11_spill] sm:$0xff]  ;;  %v1080_v47 = vmax.f32 %v989_v4, 0.0  ;;  %v981_v34 = vadd.f32 %v2654_v6, %v2203_v54  ;;  %v976_v4 = vadd.f32 %v2660_v13, %v2263_v52  ;;  %v2662_v39 = vld [vmem:[#allocation4_spill] sm:$0xff] }
 0x14b   : > { %1273 = vmatpush.msra.mxu0 %v1099_v10  ;;  %v895_v56 = vadd.f32 %v2651_v51, %v2199_v41  ;;  %v2652_v10 = vld [vmem:[#allocation12_spill] sm:$0xff]  ;;  %v1055_v52 = vmax.f32 %v885_v43, 0.0 }
 0x14c   : > { %1313 = vmatpush.msra.mxu2 %v1100_v63  ;;  %v984_v32 = vadd.f32 %v2652_v10, %v2199_v41  ;;  %v892_v63 = vadd.f32 %v2653_v11, %v2203_v54  ;;  %v979_v54 = vadd.f32 %v2658_v3, %v2257_v55  ;;  %v1060_v51 = vmax.f32 %v976_v4, 0.0 }
 0x14d   : > { %v2346_v48 = vpop.f32.mrf.mxu2  ;;  %1274 = vmatpush.msra.mxu0 %v1095_v1  ;;  %v1076_v1 = vmax.f32 %v986_v30, 0.0  ;;  %v1059_v30 = vmax.f32 %v887_v22, 0.0 }
 0x14e   : > { %2644 = vst [vmem:[#allocation27_spill] sm:$0xff] %v2346_v48  ;;  %v2350_v20 = vpop.f32.mrf.mxu3  ;;  %1314 = vmatpush.msra.mxu2 %v1096_v61  ;;  %v2352_v14 = vpop.f32.mrf.mxu0  ;;  %v1071_v61 = vmax.f32 %v895_v56, 0.0  ;;  %v1072_v60 = vmax.f32 %v984_v32, 0.0 }
 0x14f   : > { %2646 = vst [vmem:[#allocation28_spill] sm:$0xff] %v2350_v20  ;;  %v2356_v38 = vpop.f32.mrf.mxu1  ;;  %1275 = vmatpush.msra.mxu0 %v1091_v57  ;;  %v890_v57 = vadd.f32 %v2657_v33, %v2257_v55  ;;  %v974_v55 = vadd.f32 %v2662_v39, %v2277_v44  ;;  %v2668_v20 = vld [vmem:[#allocation24_spill] sm:$0xff] }
 0x150   : > { %1315 = vmatpush.msra.mxu2 %v1092_v18  ;;  %v1067_v18 = vmax.f32 %v892_v63, 0.0 }
 0x151   : > { %1276 = vmatpush.msra.mxu0 %v1087_v9  ;;  %v1068_v9 = vmax.f32 %v981_v34, 0.0  ;;  %v1056_v10 = vmax.f32 %v974_v55, 0.0 }
 0x152   : > { %1316 = vmatpush.msra.mxu2 %v1088_v17  ;;  %v1063_v17 = vmax.f32 %v890_v57, 0.0 }
 0x153   : > { %1277 = vmatpush.msra.mxu0 %v1083_v49  ;;  %v1064_v49 = vmax.f32 %v979_v54, 0.0 }
 0x154   : > { %1317 = vmatpush.msra.mxu2 %v1084_v36 }
 0x155   : > { %1278 = vmatpush.msra.mxu0 %v1079_v53  ;;  %v2372_v7 = vpop.f32.mrf.mxu2 }
 0x156   : > { %2655 = vst [vmem:[#allocation25_spill] sm:$0xff] %v2372_v7  ;;  %1318 = vmatpush.msra.mxu2 %v1080_v47  ;;  %v2374_v58 = vpop.f32.mrf.mxu0  ;;  %v2376_v31 = vpop.f32.mrf.mxu3 }
 0x157   : > { %2656 = vst [vmem:[#allocation26_spill] sm:$0xff] %v2376_v31  ;;  %v2378_v41 = vpop.f32.mrf.mxu1  ;;  %1279 = vmatpush.msra.mxu0 %v1075_v5 }
 0x158   : > { %1319 = vmatpush.msra.mxu2 %v1076_v1 }
 0x159   : > { %1280 = vmatpush.msra.mxu0 %v1071_v61 }
 0x15a   : > { %1320 = vmatpush.msra.mxu2 %v1072_v60 }
 0x15b   : > { %1281 = vmatpush.msra.mxu0 %v1067_v18 }
 0x15c   : > { %1321 = vmatpush.msra.mxu2 %v1068_v9 }
 0x15d   : > { %1282 = vmatpush.msra.mxu0 %v1063_v17  ;;  %v2396_v53 = vpop.f32.mrf.mxu2 }
 0x15e   : > { %1322 = vmatpush.msra.mxu2 %v1064_v49  ;;  %v2392_v36 = vpop.f32.mrf.mxu0  ;;  %2663 = vst [vmem:[#allocation21_spill] sm:$0xff] %v2396_v53  ;;  %v2398_v32 = vpop.f32.mrf.mxu3 }
 0x15f   : > { %v2394_v56 = vpop.f32.mrf.mxu1  ;;  %1283 = vmatpush.msra.mxu0 %v1059_v30  ;;  %2664 = vst [vmem:[#allocation22_spill] sm:$0xff] %v2398_v32  ;;  %v2665_v30 = vld [vmem:[#allocation15_spill] sm:$0xff] }
 0x160   : > { %1323 = vmatpush.msra.mxu2 %v1060_v51 }
 0x161   : > { %1284 = vmatpush.msra.mxu0 %v1055_v52  ;;  %v2666_v52 = vld [vmem:[#allocation18_spill] sm:$0xff] }
 0x162   : > { %1324 = vmatpush.msra.mxu2 %v1056_v10  ;;  %1285 = vmatmul.f32.vlgmr.msra.gmra.mxu0 %v2306_v23 }
 0x163   : > { %1325 = vmatmul.f32.vlgmr.msra.gmra.mxu2 %v2306_v23 }
 0x165   : > { %v2404_v11 = vpop.f32.mrf.mxu2 }
 0x166   : > { %v766_v44 = vpop.f32.mrf.mxu0  ;;  %v2406_v63 = vpop.f32.mrf.mxu3 }
 0x167   : > { %v2402_v47 = vpop.f32.mrf.mxu1 }
 0x16d   : > { %v2408_v34 = vpop.f32.mrf.mxu2 }
 0x16e   : > { %v768_v5 = vpop.f32.mrf.mxu0  ;;  %v2410_v1 = vpop.f32.mrf.mxu3 }
 0x16f   : > { %v857_v6 = vpop.f32.mrf.mxu1 }
 0x175   : > { %v2412_v57 = vpop.f32.mrf.mxu2 }
 0x176   : > { %v771_v61 = vpop.f32.mrf.mxu0  ;;  %v2414_v3 = vpop.f32.mrf.mxu3 }
 0x177   : > { %v860_v33 = vpop.f32.mrf.mxu1 }
 0x17d   : > { %v2416_v8 = vpop.f32.mrf.mxu2 }
 0x17e   : > { %v773_v60 = vpop.f32.mrf.mxu0  ;;  %v2418_v22 = vpop.f32.mrf.mxu3 }
 0x17f   : > { %v862_v23 = vpop.f32.mrf.mxu1 }
 0x185   : > { %v2420_v4 = vpop.f32.mrf.mxu2 }
 0x186   : > { %v776_v54 = vpop.f32.mrf.mxu0  ;;  %v2422_v17 = vpop.f32.mrf.mxu3 }
 0x187   : > { %v865_v18 = vpop.f32.mrf.mxu1  ;;  %v777_v48 = vadd.f32 %v776_v54, %v2668_v20 }
 0x188   : > { %v866_v7 = vadd.f32 %v865_v18, %v2668_v20 }
 0x18d   : > { %v2424_v49 = vpop.f32.mrf.mxu2 }
 0x18e   : > { %v778_v9 = vpop.f32.mrf.mxu0  ;;  %v2426_v39 = vpop.f32.mrf.mxu3 }
 0x18f   : > { %v867_v13 = vpop.f32.mrf.mxu1  ;;  %v779_v0 = vadd.f32 %v778_v9, %v2667_v24 }
 0x190   : > { %v868_v15 = vadd.f32 %v867_v13, %v2667_v24  ;;  %v2670_v13 = vld [vmem:[#allocation30_spill] sm:$0xff] }
 0x191   : > { %v1169_v53 = vmax.f32 %v779_v0, 0.0 }
 0x195   : > { %v2438_v9 = vpop.f32.mrf.mxu2 }
 0x196   : > { %v781_v26 = vpop.f32.mrf.mxu0  ;;  %v2441_v54 = vpop.f32.mrf.mxu3 }
 0x197   : > { %v870_v43 = vpop.f32.mrf.mxu1  ;;  %v782_v51 = vadd.f32 %v781_v26, %v2665_v30 }
 0x198   : > { %v871_v50 = vadd.f32 %v870_v43, %v2665_v30  ;;  %v1170_v43 = vmax.f32 %v868_v15, 0.0 }
 0x199   : > { %v1173_v31 = vmax.f32 %v782_v51, 0.0 }
 0x19a   : > { %v1174_v26 = vmax.f32 %v871_v50, 0.0  ;;  %v1166_v50 = vmax.f32 %v866_v7, 0.0 }
 0x19e   : > { %v783_v55 = vpop.f32.mrf.mxu0 }
 0x19f   : > { %v784_v10 = vadd.f32 %v783_v55, %v2666_v52  ;;  %v872_v42 = vpop.f32.mrf.mxu1  ;;  %v2669_v55 = vld [vmem:[#allocation29_spill] sm:$0xff] }
 0x1a0   : > { %v873_v19 = vadd.f32 %v872_v42, %v2666_v52  ;;  %v774_v32 = vadd.f32 %v773_v60, %v2669_v55  ;;  %v863_v42 = vadd.f32 %v862_v23, %v2669_v55  ;;  %v2672_v23 = vld [vmem:[#allocation32_spill] sm:$0xff] }
 0x1a1   : > { %v1177_v28 = vmax.f32 %v784_v10, 0.0  ;;  %v1165_v10 = vmax.f32 %v777_v48, 0.0  ;;  %v767_v18 = vadd.f32 %v766_v44, %v2672_v23  ;;  %v856_v48 = vadd.f32 %v2402_v47, %v2672_v23  ;;  %v2674_v44 = vld [vmem:[#allocation34_spill] sm:$0xff] }
 0x1a2   : > { %v1178_v45 = vmax.f32 %v873_v19, 0.0  ;;  %v772_v19 = vadd.f32 %v771_v61, %v2670_v13  ;;  %v1161_v0 = vmax.f32 %v774_v32, 0.0  ;;  %v1162_v15 = vmax.f32 %v863_v42, 0.0  ;;  %v2673_v61 = vld [vmem:[#allocation33_spill] sm:$0xff] }
 0x1a3   : > { %1209 = vmatpush.msrb.mxu1 %v1177_v28  ;;  %v861_v28 = vadd.f32 %v860_v33, %v2670_v13  ;;  %v764_v7 = vadd.f32 %v2392_v36, %v2673_v61  ;;  %v853_v32 = vadd.f32 %v2394_v56, %v2673_v61  ;;  %v1149_v42 = vmax.f32 %v767_v18, 0.0  ;;  %v1048_v56 = vpop.f32.mrf.mxu3 }
 0x1a4   : > { %1249 = vmatpush.msrb.mxu3 %v1178_v45  ;;  %v2671_v45 = vld [vmem:[#allocation31_spill] sm:$0xff]  ;;  %v1157_v51 = vmax.f32 %v772_v19, 0.0  ;;  %v851_v47 = vadd.f32 %v2378_v41, %v2674_v44  ;;  %v959_v19 = vpop.f32.mrf.mxu2  ;;  %v759_v36 = vadd.f32 %v2352_v14, %v2223_v62  ;;  %v846_v41 = vadd.f32 %v2332_v46, %v2227_v59 }
 0x1a5   : > { %1210 = vmatpush.msrb.mxu1 %v1173_v31  ;;  %v769_v60 = vadd.f32 %v768_v5, %v2671_v45  ;;  %v858_v31 = vadd.f32 %v857_v6, %v2671_v45  ;;  %v2453_v6 = vpop.permute.xlu1 %468  ;;  %v754_v14 = vadd.f32 %v2297_v29, %v2233_v40 }
 0x1a6   : > { %1250 = vmatpush.msrb.mxu3 %v1174_v26  ;;  %v762_v26 = vadd.f32 %v2374_v58, %v2674_v44  ;;  %v757_v58 = vadd.f32 %v2328_v35, %v2227_v59  ;;  %v752_v35 = vadd.f32 %v2271_v21, %v2453_v6  ;;  %v841_v46 = vadd.f32 %v2273_v25, %v2453_v6 }
 0x1a7   : > { %1211 = vmatpush.msrb.mxu1 %v1169_v53  ;;  %v1158_v53 = vmax.f32 %v861_v28, 0.0  ;;  %v1153_v33 = vmax.f32 %v769_v60, 0.0  ;;  %v1154_v5 = vmax.f32 %v858_v31, 0.0  ;;  %v848_v28 = vadd.f32 %v2356_v38, %v2223_v62 }
 0x1a8   : > { %1251 = vmatpush.msrb.mxu3 %v1170_v43  ;;  %v1150_v43 = vmax.f32 %v856_v48, 0.0  ;;  %v1141_v60 = vmax.f32 %v762_v26, 0.0  ;;  %v1137_v31 = vmax.f32 %v759_v36, 0.0  ;;  %v843_v38 = vadd.f32 %v2301_v2, %v2233_v40 }
 0x1a9   : > { %1212 = vmatpush.msrb.mxu1 %v1165_v10  ;;  %v1145_v10 = vmax.f32 %v764_v7, 0.0  ;;  %v1138_v18 = vmax.f32 %v848_v28, 0.0  ;;  %v1134_v48 = vmax.f32 %v846_v41, 0.0  ;;  %v1129_v7 = vmax.f32 %v754_v14, 0.0 }
 0x1aa   : > { %1252 = vmatpush.msrb.mxu3 %v1166_v50  ;;  %v1146_v50 = vmax.f32 %v853_v32, 0.0  ;;  %v1049_v28 = vadd.f32 %v1048_v56, %v2665_v30  ;;  %v952_v56 = vadd.f32 %v2420_v4, %v2669_v55  ;;  %v947_v4 = vadd.f32 %v2412_v57, %v2671_v45 }
 0x1ab   : > { %1213 = vmatpush.msrb.mxu1 %v1161_v0  ;;  %v1142_v0 = vmax.f32 %v851_v47, 0.0  ;;  %v1050_v25 = vpop.f32.mrf.mxu3  ;;  %v942_v57 = vadd.f32 %v2404_v11, %v2673_v61 }
 0x1ac   : > { %1253 = vmatpush.msrb.mxu3 %v1162_v15  ;;  %v2469_v15 = vpop.permute.xlu0 %463  ;;  %v961_v32 = vpop.f32.mrf.mxu2 }
 0x1ad   : > { %1214 = vmatpush.msrb.mxu1 %v1157_v51  ;;  %v1133_v51 = vmax.f32 %v757_v58, 0.0  ;;  %v2477_v29 = vpop.permute.xlu1 %458  ;;  %v838_v2 = vadd.f32 %v2247_v27, %v2469_v15  ;;  %v962_v47 = vadd.f32 %v961_v32, %v2666_v52  ;;  %v1051_v27 = vadd.f32 %v1050_v25, %v2666_v52  ;;  %v2681_v25 = vld [vmem:[#allocation41_spill] sm:$0xff] }
 0x1ae   : > { %1254 = vmatpush.msrb.mxu3 %v1158_v53  ;;  %v749_v53 = vadd.f32 %v2243_v12, %v2469_v15  ;;  %v747_v21 = vadd.f32 %v2213_v37, %v2477_v29  ;;  %v836_v26 = vadd.f32 %v2217_v16, %v2477_v29  ;;  %v2493_v37 = vld [vmem:[%s2582_s3 + $0x8] sm:$0xff]  ;;  %v1046_v52 = vadd.f32 %v2441_v54, %v2667_v24 }
 0x1af   : > { %1215 = vmatpush.msrb.mxu1 %v1153_v33  ;;  %v1130_v33 = vmax.f32 %v843_v38, 0.0  ;;  %v1179_v58 = vmax.f32 %v962_v47, 0.0  ;;  %v1041_v54 = vadd.f32 %v2422_v17, %v2669_v55  ;;  %v1036_v17 = vadd.f32 %v2414_v3, %v2671_v45 }
 0x1b0   : > { %1255 = vmatpush.msrb.mxu3 %v1154_v5  ;;  %v1125_v5 = vmax.f32 %v752_v35, 0.0  ;;  %v1121_v12 = vmax.f32 %v749_v53, 0.0  ;;  %v1117_v36 = vmax.f32 %v747_v21, 0.0  ;;  %v1118_v16 = vmax.f32 %v836_v26, 0.0  ;;  %v2675_v35 = vld [vmem:[#allocation21_spill] sm:$0xff]  ;;  %v2680_v21 = vld [vmem:[#allocation28_spill] sm:$0xff] }
 0x1b1   : > { %1216 = vmatpush.msrb.mxu1 %v1149_v42  ;;  %v1126_v42 = vmax.f32 %v841_v46, 0.0  ;;  %v1164_v55 = vmax.f32 %v1041_v54, 0.0  ;;  %v1031_v3 = vadd.f32 %v2406_v63, %v2673_v61  ;;  %v1156_v45 = vmax.f32 %v1036_v17, 0.0  ;;  %v2676_v46 = vld [vmem:[#allocation22_spill] sm:$0xff]  ;;  %v1353_v17 = vld [vmem:[%s2584_s5] sm:$0x3] }
 0x1b2   : > { %1256 = vmatpush.msrb.mxu3 %v1150_v43  ;;  %v1122_v43 = vmax.f32 %v838_v2, 0.0  ;;  %v1147_v53 = vmax.f32 %v942_v57, 0.0  ;;  %v2679_v2 = vld [vmem:[#allocation27_spill] sm:$0xff]  ;;  %v932_v26 = vadd.f32 %v2681_v25, %v2233_v40 }
 0x1b3   : > { %1217 = vmatpush.msrb.mxu1 %v1145_v10  ;;  %v960_v10 = vadd.f32 %v959_v19, %v2665_v30  ;;  %v955_v19 = vadd.f32 %v2424_v49, %v2668_v20  ;;  %v1044_v30 = vadd.f32 %v2426_v39, %v2668_v20  ;;  %v950_v49 = vadd.f32 %v2416_v8, %v2670_v13 }
 0x1b4   : > { %1257 = vmatpush.msrb.mxu3 %v1146_v50  ;;  %v957_v50 = vadd.f32 %v2438_v9, %v2667_v24  ;;  %v1176_v9 = vmax.f32 %v1049_v28, 0.0  ;;  %v1039_v20 = vadd.f32 %v2418_v22, %v2670_v13  ;;  %v945_v8 = vadd.f32 %v2408_v34, %v2672_v23  ;;  %v2685_v28 = vld [vmem:[#allocation37_spill] sm:$0xff] }
 0x1b5   : > { %1218 = vmatpush.msrb.mxu1 %v1141_v60  ;;  %v1180_v60 = vmax.f32 %v1051_v27, 0.0  ;;  %v1175_v41 = vmax.f32 %v960_v10, 0.0  ;;  %v1167_v14 = vmax.f32 %v955_v19, 0.0  ;;  %v1168_v39 = vmax.f32 %v1044_v30, 0.0  ;;  %v2684_v10 = vld [vmem:[#allocation40_spill] sm:$0xff]  ;;  %v2687_v19 = vld [vmem:[#allocation35_spill] sm:$0xff] }
 0x1b6   : > { %1258 = vmatpush.msrb.mxu3 %v1142_v0  ;;  %v1171_v24 = vmax.f32 %v957_v50, 0.0  ;;  %v1172_v0 = vmax.f32 %v1046_v52, 0.0  ;;  %v1159_v38 = vmax.f32 %v950_v49, 0.0  ;;  %v1034_v22 = vadd.f32 %v2410_v1, %v2672_v23  ;;  %v2686_v52 = vld [vmem:[#allocation38_spill] sm:$0xff] }
 0x1b7   : > { %1219 = vmatpush.msrb.mxu1 %v1137_v31  ;;  %v1163_v31 = vmax.f32 %v952_v56, 0.0  ;;  %v1160_v13 = vmax.f32 %v1039_v20, 0.0  ;;  %v940_v34 = vadd.f32 %v2675_v35, %v2674_v44  ;;  %v1029_v1 = vadd.f32 %v2676_v46, %v2674_v44 }
 0x1b8   : > { %1259 = vmatpush.msrb.mxu3 %v1138_v18  ;;  %v1155_v18 = vmax.f32 %v947_v4, 0.0  ;;  %v1152_v23 = vmax.f32 %v1034_v22, 0.0  ;;  %v1148_v61 = vmax.f32 %v1031_v3, 0.0  ;;  %v1024_v44 = vadd.f32 %v2680_v21, %v2227_v59 }
 0x1b9   : > { %1220 = vmatpush.msrb.mxu1 %v1133_v51  ;;  %v1151_v51 = vmax.f32 %v945_v8, 0.0  ;;  %v1143_v32 = vmax.f32 %v940_v34, 0.0  ;;  %v927_v50 = vadd.f32 %v2685_v28, %v2469_v15 }
 0x1ba   : > { %1260 = vmatpush.msrb.mxu3 %v1134_v48  ;;  %v2677_v48 = vld [vmem:[#allocation25_spill] sm:$0xff] }
 0x1bb   : > { %1221 = vmatpush.msrb.mxu1 %v1129_v7  ;;  %v937_v11 = vadd.f32 %v2677_v48, %v2223_v62  ;;  %v2678_v7 = vld [vmem:[#allocation26_spill] sm:$0xff] }
 0x1bc   : > { %1261 = vmatpush.msrb.mxu3 %v1130_v33  ;;  %v1026_v63 = vadd.f32 %v2678_v7, %v2223_v62  ;;  %v935_v33 = vadd.f32 %v2679_v2, %v2227_v59  ;;  %v1019_v59 = vadd.f32 %v2684_v10, %v2453_v6 }
 0x1bd   : > { %1222 = vmatpush.msrb.mxu1 %v1125_v5  ;;  %v1144_v5 = vmax.f32 %v1029_v1, 0.0 }
 0x1be   : > { %1262 = vmatpush.msrb.mxu3 %v1126_v42  ;;  %v1139_v42 = vmax.f32 %v937_v11, 0.0  ;;  %v1140_v47 = vmax.f32 %v1026_v63, 0.0  ;;  %v1128_v56 = vmax.f32 %v1019_v59, 0.0 }
 0x1bf   : > { %1223 = vmatpush.msrb.mxu1 %v1121_v12  ;;  %v2682_v12 = vld [vmem:[#allocation42_spill] sm:$0xff] }
 0x1c0   : > { %1263 = vmatpush.msrb.mxu3 %v1122_v43  ;;  %v1021_v62 = vadd.f32 %v2682_v12, %v2233_v40  ;;  %v2683_v43 = vld [vmem:[#allocation39_spill] sm:$0xff]  ;;  %v1016_v40 = vadd.f32 %v2686_v52, %v2469_v15  ;;  %v1206_v15 = vpop.f32.mrf.mxu0 }
 0x1c1   : > { %1224 = vmatpush.msrb.mxu1 %v1117_v36  ;;  %v930_v27 = vadd.f32 %v2683_v43, %v2453_v6  ;;  %v1135_v36 = vmax.f32 %v935_v33, 0.0 }
 0x1c2   : > { %1264 = vmatpush.msrb.mxu3 %v1118_v16  ;;  %1225 = vmatmul.f32.vlgmr.msrb.gmra.mxu1 %v2493_v37  ;;  %v1136_v16 = vmax.f32 %v1024_v44, 0.0  ;;  %v1124_v54 = vmax.f32 %v1016_v40, 0.0 }
 0x1c3   : > { %1265 = vmatmul.f32.vlgmr.msrb.gmra.mxu3 %v2493_v37  ;;  %1289 = vmatpush.msra.mxu1 %v1179_v58  ;;  %v1131_v58 = vmax.f32 %v932_v26, 0.0  ;;  %v1127_v30 = vmax.f32 %v930_v27, 0.0 }
 0x1c4   : > { %1329 = vmatpush.msra.mxu3 %v1180_v60  ;;  %v1132_v60 = vmax.f32 %v1021_v62, 0.0 }
 0x1c5   : > { %1290 = vmatpush.msra.mxu1 %v1175_v41  ;;  %v925_v41 = vadd.f32 %v2687_v19, %v2477_v29 }
 0x1c6   : > { %1330 = vmatpush.msra.mxu3 %v1176_v9  ;;  %v2688_v9 = vld [vmem:[#allocation36_spill] sm:$0xff]  ;;  %v1246_v4 = vpop.f32.mrf.mxu2 }
 0x1c7   : > { %1291 = vmatpush.msra.mxu1 %v1171_v24  ;;  %v1014_v6 = vadd.f32 %v2688_v9, %v2477_v29  ;;  %v1123_v24 = vmax.f32 %v927_v50, 0.0 }
 0x1c8   : > { %1331 = vmatpush.msra.mxu3 %v1172_v0  ;;  %v1119_v0 = vmax.f32 %v925_v41, 0.0 }
 0x1c9   : > { %1292 = vmatpush.msra.mxu1 %v1167_v14  ;;  %v1120_v49 = vmax.f32 %v1014_v6, 0.0  ;;  %v1187_v14 = vpop.permute.xlu2 %1186 }
 0x1ca   : > { %1332 = vmatpush.msra.mxu3 %v1168_v39  ;;  %v1207_v20 = vadd.f32 %v1206_v15, %v1187_v14 }
 0x1cb   : > { %1293 = vmatpush.msra.mxu1 %v1163_v31 }
 0x1cc   : > { %1333 = vmatpush.msra.mxu3 %v1164_v55  ;;  %v1247_v55 = vadd.f32 %v1246_v4, %v1187_v14 }
 0x1cd   : > { %1294 = vmatpush.msra.mxu1 %v1159_v38 }
 0x1ce   : > { %1334 = vmatpush.msra.mxu3 %v1160_v13 }
 0x1cf   : > { %1295 = vmatpush.msra.mxu1 %v1155_v18 }
 0x1d0   : > { %1335 = vmatpush.msra.mxu3 %v1156_v45 }
 0x1d1   : > { %1296 = vmatpush.msra.mxu1 %v1151_v51 }
 0x1d2   : > { %1336 = vmatpush.msra.mxu3 %v1152_v23  ;;  %v1358_v23 = vpop.permute.xlu0 %1357 }
 0x1d3   : > { %1297 = vmatpush.msra.mxu1 %v1147_v53 }
 0x1d4   : > { %1337 = vmatpush.msra.mxu3 %v1148_v61 }
 0x1d5   : > { %1298 = vmatpush.msra.mxu1 %v1143_v32 }
 0x1d6   : > { %1338 = vmatpush.msra.mxu3 %v1144_v5 }
 0x1d7   : > { %1299 = vmatpush.msra.mxu1 %v1139_v42 }
 0x1d8   : > { %1339 = vmatpush.msra.mxu3 %v1140_v47 }
 0x1d9   : > { %1300 = vmatpush.msra.mxu1 %v1135_v36 }
 0x1da   : > { %1340 = vmatpush.msra.mxu3 %v1136_v16 }
 0x1db   : > { %1301 = vmatpush.msra.mxu1 %v1131_v58 }
 0x1dc   : > { %1341 = vmatpush.msra.mxu3 %v1132_v60 }
 0x1dd   : > { %1302 = vmatpush.msra.mxu1 %v1127_v30 }
 0x1de   : > { %1342 = vmatpush.msra.mxu3 %v1128_v56 }
 0x1df   : > { %1303 = vmatpush.msra.mxu1 %v1123_v24 }
 0x1e0   : > { %1343 = vmatpush.msra.mxu3 %v1124_v54 }
 0x1e1   : > { %1304 = vmatpush.msra.mxu1 %v1119_v0 }
 0x1e2   : > { %1344 = vmatpush.msra.mxu3 %v1120_v49  ;;  %1305 = vmatmul.f32.vlgmr.msra.gmra.mxu1 %v2493_v37 }
 0x1e3   : > { %1345 = vmatmul.f32.vlgmr.msra.gmra.mxu3 %v2493_v37  ;;  %v1286_v37 = vpop.f32.mrf.mxu0 }
 0x1e4   : > { %v1287_v13 = vadd.f32 %v1286_v37, %v1187_v14 }
 0x1e6   : > { %v1326_v3 = vpop.f32.mrf.mxu2 }
 0x1e7   : > { %v1327_v35 = vadd.f32 %v1326_v3, %v1187_v14 }
 0x23f   : > { %v1226_v29 = vpop.f32.mrf.mxu1 }
 0x240   : > { %v1227_v39 = vadd.f32 %v1226_v29, %v1207_v20 }
 0x242   : > { %v1349_v31 = vmax.f32 %v1227_v39, 0.0 }
 0x244   : > { %1379 = vmatpush.msrb.mxu0 %v1349_v31 }
 0x245   : > { %1675 = vmatmul.msk.f32.vlgmr.msrb.gmra.mxu0 %vm1360_vm3, %v1353_v17 }
 0x246   : > { %v1266_v8 = vpop.f32.mrf.mxu3 }
 0x247   : > { %v1267_v38 = vadd.f32 %v1266_v8, %v1247_v55 }
 0x249   : > { %v1350_v22 = vmax.f32 %v1267_v38, 0.0 }
 0x24b   : > { %1399 = vmatpush.msrb.mxu1 %v1350_v22 }
 0x24c   : > { %1676 = vmatmul.msk.f32.vlgmr.msrb.gmra.mxu1 %vm1360_vm3, %v1353_v17 }
 0x25f   : > { %v1306_v57 = vpop.f32.mrf.mxu1 }
 0x260   : > { %v1307_v18 = vadd.f32 %v1306_v57, %v1287_v13 }
 0x262   : > { %v1351_v45 = vmax.f32 %v1307_v18, 0.0 }
 0x264   : > { %1419 = vmatpush.msrb.mxu2 %v1351_v45 }
 0x265   : > { %1677 = vmatmul.msk.f32.vlgmr.msrb.gmra.mxu2 %vm1360_vm3, %v1353_v17 }
 0x266   : > { %v1346_v34 = vpop.f32.mrf.mxu3 }
 0x267   : > { %v1347_v51 = vadd.f32 %v1346_v34, %v1327_v35 }
 0x269   : > { %v1352_v46 = vmax.f32 %v1347_v51, 0.0 }
 0x26b   : > { %1439 = vmatpush.msrb.mxu3 %v1352_v46 }
 0x26c   : > { %1678 = vmatmul.msk.f32.vlgmr.msrb.gmra.mxu3 %vm1360_vm3, %v1353_v17 }
 0x2c2   : > { %v1381_v7 = vpop.f32.mrf.mxu0 }
 0x2c3   : > { %v1382_v33 = vadd.f32 %v1381_v7, %v1358_v23 }
 0x2c9   : > { %v1401_v1 = vpop.f32.mrf.mxu1 }
 0x2ca   : > { %v1402_v11 = vadd.f32 %v1401_v1, %v1358_v23 }
 0x2cc   : > { %v1448_v61 = vrot.slane %v1402_v11, 6 }
 0x2ce   : > { %v1452_v44 = vsel %vm1451_vm4, %v1382_v33, %v1448_v61 }
 0x2e8   : > { %v1421_v48 = vpop.f32.mrf.mxu2 }
 0x2e9   : > { %v1422_v53 = vadd.f32 %v1421_v48, %v1358_v23 }
 0x2eb   : > { %v1449_v32 = vrot.slane %v1422_v53, 4 }
 0x2ef   : > { %v1441_v63 = vpop.f32.mrf.mxu3 }
 0x2f0   : > { %v1442_v2 = vadd.f32 %v1441_v63, %v1358_v23 }
 0x2f2   : > { %v1450_v21 = vrot.slane %v1442_v2, 2 }
 0x2f4   : > { %v1454_v5 = vsel %vm1453_vm5, %v1449_v32, %v1450_v21 }
 0x2f5   : > { %v1455_v25 = vsel %vm681_vm0, %v1452_v44, %v1454_v5 }
 0x2f6   : > { %1457 = vst [vmem:[%s305_s27] sm:$0xff] %v1455_v25 }
 0x2f7 PF: > { %p14_p9 = scmp.ge.s32.totalorder %s1814_s28, 4   ;;  %s2689_s24 = smov %s1749_s25 }
 0x2f8   : > { %s2690_s25 = smov %s1823_s8  ;;  %s2691_s26 = smov %s1814_s28 }
 0x2f9   :  { %16 = sbr.rel (!%p14_p9) target bundleno = 2 (0x2), region = 106 }

</bundles_post_ra>
